<compile_context>
chip_gen: v5e
topology: v5e:2x2
jax: 0.10.0
libtpu: 0.0.40
codegen_flags: <defaults>
</compile_context>

<pallas_src>
import jax
import jax.numpy as jnp
from jax import lax
from jax.experimental import pallas as pl
from jax.experimental.pallas import tpu as pltpu


def mlp_kernel(x_ref, w1_ref, w2_ref, bp_ref, o_ref):
    # x_ref : (tm, F)  f32   native layout, batch on sublanes
    # w1_ref: (H, F)   bf16  (= w1.T)
    # w2_ref: (H, H)   bf16  (= w2.T)
    # bp_ref: (H, 4)   f32   packed [b1 | b2 | w3 | b3 (broadcast)]
    # o_ref : (1, tm)  f32   lane-dense output block (batch on lanes)
    bp = bp_ref[...]
    b1 = bp[:, 0:1]
    b2 = bp[:, 1:2]
    w3 = bp[:, 2:3]
    b3 = bp[0:1, 3:4]

    xb = x_ref[...].astype(jnp.bfloat16)                       # (tm, F)

    # Layer 1: Linear(13 -> 64) + ReLU.
    # MXU "NT" matmul: contract both minor dims -> (H, tm); batch ends up on
    # lanes without ever materializing an x transpose in HBM or VMEM.
    h = lax.dot_general(
        w1_ref[...], xb,
        dimension_numbers=(((1,), (1,)), ((), ())),
        preferred_element_type=jnp.float32)
    h = jnp.maximum(h + b1, 0.0)

    # Dropout(p=0.1): identity in eval mode.
    # TODO(synk): training-mode dropout not implemented (eval semantics only).

    # Layer 2: Linear(64 -> 64) + ReLU   -> (H, tm)
    h = jnp.dot(w2_ref[...], h.astype(jnp.bfloat16),
                preferred_element_type=jnp.float32)
    h = jnp.maximum(h + b2, 0.0)

    # Layer 3: Linear(64 -> 1) as a VPU multiply + sublane (XLU) reduction,
    # kept off the (binding) MXU; result stays lane-major: (1, tm).
    o = jnp.sum(h * w3, axis=0, keepdims=True) + b3
    o_ref[...] = o.astype(o_ref.dtype)


def net_forward(x, params, *, tm=None):
    """x: [B, 13] float32 -> [B, 1] float32 (eval-mode forward)."""
    w1, b1, w2, b2, w3, b3 = params
    B, F = x.shape
    H1 = w1.shape[1]
    H2 = w2.shape[1]
    O = w3.shape[1]
    assert O == 1, "Net's last layer is Linear(64, 1)"
    assert H1 == H2, "packed-parameter layout assumes equal hidden widths"

    if tm is None:
        cap = 4096  # sweep 2048 / 4096 / 8192 per TPU generation
        if B >= 256:
            # Guarantee >= 2 grid steps so v7x's two TensorCores both get work.
            tm = min(cap, 128 * pl.cdiv(pl.cdiv(B, 2), 128))
        else:
            # Small batch: single grid step, blocks equal full array dims.
            tm = B
    grid = (pl.cdiv(B, tm),)

    # One-time, tiny parameter repacking (no HBM round trip of x).
    w1t = w1.T.astype(jnp.bfloat16)                             # (H, F)
    w2t = w2.T.astype(jnp.bfloat16)                             # (H, H)
    bpack = jnp.concatenate(
        [b1.reshape(H1, 1), b2.reshape(H2, 1), w3.reshape(H2, 1),
         jnp.broadcast_to(b3.reshape(1, 1), (H2, 1))],
        axis=1).astype(jnp.float32)                             # (H, 4)

    in_specs = [
        pl.BlockSpec((tm, F), lambda i: (i, 0)),                # x, native [B,13]
        pl.BlockSpec((H1, F), lambda i: (0, 0)),                # w1^T (grid-invariant)
        pl.BlockSpec((H2, H1), lambda i: (0, 0)),               # w2^T (grid-invariant)
        pl.BlockSpec((H2, 4), lambda i: (0, 0)),                # packed b1|b2|w3|b3
    ]
    out_spec = pl.BlockSpec((1, tm), lambda i: (0, i))          # lane-dense output

    out = pl.pallas_call(
        mlp_kernel,
        out_shape=jax.ShapeDtypeStruct((1, B), jnp.float32),
        grid_spec=pltpu.PrefetchScalarGridSpec(
            num_scalar_prefetch=0,
            grid=grid,
            in_specs=in_specs,
            out_specs=out_spec,
        ),
        compiler_params=pltpu.CompilerParams(
            dimension_semantics=("parallel",),
        ),
    )(x, w1t, w2t, bpack)

    return out.reshape(B, O)


def init_params(key):
    """Deterministic init matching the PyTorch layer shapes.

    PyTorch Linear stores weight as [out, in]; here we store [in, out] and the
    wrapper transposes/casts into the kernel's batch-on-lanes layout.
    """
    k1, k2, k3, k4, k5, k6 = jax.random.split(key, 6)

    def uniform(k, shape, fan_in):
        bound = 1.0 / jnp.sqrt(fan_in)
        return jax.random.uniform(k, shape, jnp.float32, -bound, bound)

    w1 = uniform(k1, (13, 64), 13.0)
    b1 = uniform(k2, (1, 64), 13.0)
    w2 = uniform(k3, (64, 64), 64.0)
    b2 = uniform(k4, (1, 64), 64.0)
    w3 = uniform(k5, (64, 1), 64.0)
    b3 = uniform(k6, (1, 1), 64.0)
    return (w1, b1, w2, b2, w3, b3)


def net_forward_ref(x, params, *, matmul_dtype=jnp.float32):
    """Pure-JAX reference of the forward pass (eval mode)."""
    w1, b1, w2, b2, w3, b3 = params
    h = jnp.dot(x.astype(matmul_dtype), w1.astype(matmul_dtype),
                preferred_element_type=jnp.float32)
    h = jnp.maximum(h + b1, 0.0)
    h = jnp.dot(h.astype(matmul_dtype), w2.astype(matmul_dtype),
                preferred_element_type=jnp.float32)
    h = jnp.maximum(h + b2, 0.0)
    return jnp.dot(h, w3, preferred_element_type=jnp.float32) + b3


if __name__ == "__main__":
    key = jax.random.PRNGKey(0)
    pkey, xkey = jax.random.split(key)

    params = init_params(pkey)

    # Small batch (13 input features per the module); single-step path.
    B = 64
    x = jax.random.normal(xkey, (B, 13), dtype=jnp.float32)

    out = jax.block_until_ready(net_forward(x, params))
    assert out.shape == (B, 1), out.shape

    ref_bf16 = net_forward_ref(x, params, matmul_dtype=jnp.bfloat16)
    ref_f32 = net_forward_ref(x, params, matmul_dtype=jnp.float32)
    assert jnp.allclose(out, ref_bf16, atol=5e-3, rtol=5e-3), "mismatch vs bf16 reference"
    assert jnp.allclose(out, ref_f32, atol=3e-2, rtol=3e-2), "mismatch vs f32 reference"

    # Multi-step path with a ragged last block (exercises masked tail writes
    # on the lane-dense (1, tm) output block).
    B2 = 200
    x2 = jax.random.normal(jax.random.PRNGKey(1), (B2, 13), dtype=jnp.float32)
    out2 = jax.block_until_ready(net_forward(x2, params, tm=128))
    ref2 = net_forward_ref(x2, params, matmul_dtype=jnp.bfloat16)
    assert out2.shape == (B2, 1), out2.shape
    assert jnp.allclose(out2, ref2, atol=5e-3, rtol=5e-3), "mismatch on ragged path"

    print("KERNEL_OK")
</pallas_src>

<mosaic_0001>
module attributes {stable_mosaic.version = 11 : i64} {
  func.func @mlp_kernel(%arg0: i32, %arg1: memref<64x13xf32, #tpu.memory_space<vmem>>, %arg2: memref<64x13xbf16, #tpu.memory_space<vmem>>, %arg3: memref<64x64xbf16, #tpu.memory_space<vmem>>, %arg4: memref<64x4xf32, #tpu.memory_space<vmem>>, %arg5: memref<1x64xf32, #tpu.memory_space<vmem>>) attributes {dimension_semantics = [#tpu.dimension_semantics<parallel>], iteration_bounds = array<i64: 1>, scalar_prefetch = 0 : i64, scratch_operands = 0 : i64, tpu.core_type = #tpu.core_type<tc>, window_params = [{transform_indices = @transform_0, window_bounds = array<i64: 64, 13>}, {pipeline_mode = #tpu.pipeline_mode<synchronous>, transform_indices = @transform_1, window_bounds = array<i64: 64, 13>}, {pipeline_mode = #tpu.pipeline_mode<synchronous>, transform_indices = @transform_2, window_bounds = array<i64: 64, 64>}, {pipeline_mode = #tpu.pipeline_mode<synchronous>, transform_indices = @transform_3, window_bounds = array<i64: 64, 4>}, {transform_indices = @transform_4, window_bounds = array<i64: 1, 64>}]} {
    %c0 = arith.constant 0 : index
    %c0_0 = arith.constant 0 : index
    %0 = vector.load %arg4[%c0, %c0_0] : memref<64x4xf32, #tpu.memory_space<vmem>>, vector<64x4xf32>
    %1 = vector.extract_strided_slice %0 {offsets = [0, 0], sizes = [64, 1], strides = [1, 1]} : vector<64x4xf32> to vector<64x1xf32>
    %2 = vector.extract_strided_slice %0 {offsets = [0, 1], sizes = [64, 1], strides = [1, 1]} : vector<64x4xf32> to vector<64x1xf32>
    %3 = vector.extract_strided_slice %0 {offsets = [0, 2], sizes = [64, 1], strides = [1, 1]} : vector<64x4xf32> to vector<64x1xf32>
    %4 = vector.extract_strided_slice %0 {offsets = [0, 3], sizes = [1, 1], strides = [1, 1]} : vector<64x4xf32> to vector<1x1xf32>
    %c0_1 = arith.constant 0 : index
    %c0_2 = arith.constant 0 : index
    %5 = vector.load %arg1[%c0_1, %c0_2] : memref<64x13xf32, #tpu.memory_space<vmem>>, vector<64x13xf32>
    %6 = arith.truncf %5 : vector<64x13xf32> to vector<64x13xbf16>
    %c0_3 = arith.constant 0 : index
    %c0_4 = arith.constant 0 : index
    %7 = vector.load %arg2[%c0_3, %c0_4] : memref<64x13xbf16, #tpu.memory_space<vmem>>, vector<64x13xbf16>
    %cst = arith.constant dense<0.000000e+00> : vector<64x64xf32>
    %8 = tpu.matmul %7, %6, %cst {dimension_numbers = #tpu.dot_dimension_numbers<[1], [1], [0], [0], [0, 0, 1, 0], [], []>} : vector<64x13xbf16>, vector<64x13xbf16>, vector<64x64xf32> -> vector<64x64xf32>
    %9 = vector.broadcast %1 : vector<64x1xf32> to vector<64x64xf32>
    %10 = arith.addf %8, %9 : vector<64x64xf32>
    %cst_5 = arith.constant 0.000000e+00 : f32
    %11 = vector.broadcast %cst_5 : f32 to vector<64x64xf32>
    %12 = arith.maximumf %10, %11 : vector<64x64xf32>
    %c0_6 = arith.constant 0 : index
    %c0_7 = arith.constant 0 : index
    %13 = vector.load %arg3[%c0_6, %c0_7] : memref<64x64xbf16, #tpu.memory_space<vmem>>, vector<64x64xbf16>
    %14 = arith.truncf %12 : vector<64x64xf32> to vector<64x64xbf16>
    %cst_8 = arith.constant dense<0.000000e+00> : vector<64x64xf32>
    %15 = tpu.matmul %13, %14, %cst_8 {dimension_numbers = #tpu.dot_dimension_numbers<[1], [0], [0], [1], [0, 0, 1, 1], [], []>} : vector<64x64xbf16>, vector<64x64xbf16>, vector<64x64xf32> -> vector<64x64xf32>
    %16 = vector.broadcast %2 : vector<64x1xf32> to vector<64x64xf32>
    %17 = arith.addf %15, %16 : vector<64x64xf32>
    %cst_9 = arith.constant 0.000000e+00 : f32
    %18 = vector.broadcast %cst_9 : f32 to vector<64x64xf32>
    %19 = arith.maximumf %17, %18 : vector<64x64xf32>
    %20 = vector.broadcast %3 : vector<64x1xf32> to vector<64x64xf32>
    %21 = arith.mulf %19, %20 : vector<64x64xf32>
    %cst_10 = arith.constant dense<0.000000e+00> : vector<64xf32>
    %22 = vector.multi_reduction <add>, %21, %cst_10 [0] : vector<64x64xf32> to vector<64xf32>
    %23 = vector.shape_cast %22 : vector<64xf32> to vector<1x64xf32>
    %24 = vector.broadcast %4 : vector<1x1xf32> to vector<1x64xf32>
    %25 = arith.addf %23, %24 : vector<1x64xf32>
    %c0_11 = arith.constant 0 : index
    %c0_12 = arith.constant 0 : index
    %26 = vector.load %arg5[%c0_11, %c0_12] : memref<1x64xf32, #tpu.memory_space<vmem>>, vector<1x64xf32>
    tpu.vector_store %arg5[%c0_11, %c0_12], %25 {strides = array<i32>} : memref<1x64xf32, #tpu.memory_space<vmem>>, vector<1x64xf32>,
    return
  }
  func.func @transform_0(%arg0: i32) -> (i32, i32) {
    %c0_i32 = arith.constant 0 : i32
    %c0_i32_0 = arith.constant 0 : i32
    return %arg0, %c0_i32 : i32, i32
  }
  func.func @transform_1(%arg0: i32) -> (i32, i32) {
    %c0_i32 = arith.constant 0 : i32
    %c0_i32_0 = arith.constant 0 : i32
    %c0_i32_1 = arith.constant 0 : i32
    return %c0_i32, %c0_i32_0 : i32, i32
  }
  func.func @transform_2(%arg0: i32) -> (i32, i32) {
    %c0_i32 = arith.constant 0 : i32
    %c0_i32_0 = arith.constant 0 : i32
    %c0_i32_1 = arith.constant 0 : i32
    return %c0_i32, %c0_i32_0 : i32, i32
  }
  func.func @transform_3(%arg0: i32) -> (i32, i32) {
    %c0_i32 = arith.constant 0 : i32
    %c0_i32_0 = arith.constant 0 : i32
    %c0_i32_1 = arith.constant 0 : i32
    return %c0_i32, %c0_i32_0 : i32, i32
  }
  func.func @transform_4(%arg0: i32) -> (i32, i32) {
    %c0_i32 = arith.constant 0 : i32
    %c0_i32_0 = arith.constant 0 : i32
    return %c0_i32, %arg0 : i32, i32
  }
}

</mosaic_0001>

<bundles_post_ra>
// kernel: tpu_custom_call.1
= control target key start
LH: loop header
LB: loop body
LE: loop exit
PB: predicated region body
PF: predicated region fallthrough
CT: control target
= control target key end

     0   :  { %vm107_vm0 = vcmask 105472   ;;  %s635_s0 = inlined_call_operand.vmem [shape: f32[64,13], index: 0, kind: input, shape index: {}]   ;;  %s636_s1 = inlined_call_operand.vmem [shape: bf16[64,13], index: 1, kind: input, shape index: {}]   ;;  %s637_s2 = inlined_call_operand.vmem [shape: bf16[64,64], index: 2, kind: input, shape index: {}]   ;;  %s638_s3 = inlined_call_operand.vmem [shape: f32[64,4], index: 3, kind: input, shape index: {}]   ;;  %s639_s4 = inlined_call_operand.hbm [shape: f32[1,64], index: 4, kind: output, shape index: {}]  }
   0x1   :  { %v33_v0 = vld [vmem:[%s635_s0 + $0x30] sm:$0xff]  ;;  %v34_v1 = vld [vmem:[%s635_s0 + $0x38] sm:$0xff]  ;;  %v31_v3 = vld [vmem:[%s635_s0 + $0x20] sm:$0xff] }
   0x2   :  { %v38_v2 = vpack.c.bf16 %v34_v1, %v33_v0  ;;  %v32_v4 = vld [vmem:[%s635_s0 + $0x28] sm:$0xff]  ;;  %v515_v6 = vld [vmem:[%s638_s3 + $0x30] sm:$0xff]  ;;  %v520_v7 = vld [vmem:[%s638_s3 + $0x20] sm:$0xff] }
   0x4   :  { %v130_v5 = vsel %vm107_vm0, %v38_v2, 0 }
   0x5   :  { %415 = vmatpush.bf16.xpose.msra.mxu2 %v130_v5  ;;  %136 = vmatpush.bf16.xpose.msra.mxu0 %v130_v5 }
   0x6   :  { %9 = vsyncpa [#allocation3], 0  ;;  %v37_v8 = vpack.c.bf16 %v32_v4, %v31_v3  ;;  %v469_v9 = vmov 0   ;;  %v29_v11 = vld [vmem:[%s635_s0 + $0x10] sm:$0xff]  ;;  %v30_v12 = vld [vmem:[%s635_s0 + $0x18] sm:$0xff]  ;;  %v470_v36 = vmov 1  }
   0x7   :  { %429 = vset.pattern.permute.xlu1 %v469_v9  ;;  %428 = vset.pattern.permute.xlu0 %v469_v9  ;;  %v36_v13 = vpack.c.bf16 %v30_v12, %v29_v11  ;;  %v27_v15 = vld [vmem:[%s635_s0] sm:$0xff]  ;;  %v28_v16 = vld [vmem:[%s635_s0 + $0x8] sm:$0xff]  ;;  %v541_v17 = vld [vmem:[%s638_s3 + $0x38] sm:$0xff]  ;;  %v471_v58 = vmov 2   ;;  %vm233_vm1 = vcmask 523264   ;;  %v472_v5 = vmov 3  }
   0x8   :  { %79 = vperm.xlu0 %428, %v515_v6   ;;  %69 = vperm.xlu1 %429, %v520_v7   ;;  %v127_v10 = vsel %vm107_vm0, %v37_v8, 0  ;;  %v546_v18 = vld [vmem:[%s638_s3 + $0x28] sm:$0xff]  ;;  %v551_v19 = vld [vmem:[%s638_s3 + $0x10] sm:$0xff]  ;;  %v35_v20 = vpack.c.bf16 %v28_v16, %v27_v15  ;;  %v563_v23 = vld [vmem:[%s638_s3] sm:$0xff]  ;;  %s358_s11 = sshll.u32 %s639_s4, 4  ;;  %vm349_vm2 = vcmask 516096   ;;  %s359_s11 = int_to_ptr.hbm [resolvable:$true] %s358_s11 }
   0x9   :  { %430 = vset.pattern.permute.xlu2 %v469_v9  ;;  %v124_v14 = vsel %vm107_vm0, %v36_v13, 0  ;;  %v20_v22 = vld [vmem:[%s638_s3 + $0x8] sm:$0xff]  ;;  %v568_v24 = vld [vmem:[%s638_s3 + $0x18] sm:$0xff]  ;;  %v409_v25 = vld [vmem:[%s636_s1 + $0x10] sm:$0xff] }
   0xa   :  { %59 = vperm.xlu2 %430, %v551_v19   ;;  %v121_v21 = vsel %vm107_vm0, %v35_v20, 0  ;;  %v407_v26 = vld [vmem:[%s636_s1] sm:$0xff]  ;;  %v410_v27 = vld [vmem:[%s636_s1 + $0x18] sm:$0xff]  ;;  %v408_v28 = vld [vmem:[%s636_s1 + $0x8] sm:$0xff] }
   0xb   :  { %v411_v3 = vld [vmem:[%s637_s2] sm:$0xff]  ;;  %v412_v4 = vld [vmem:[%s637_s2 + $0x8] sm:$0xff] }
   0xd   :  { %416 = vmatpush.bf16.xpose.msra.mxu2 %v127_v10  ;;  %137 = vmatpush.bf16.xpose.msra.mxu0 %v127_v10 }
  0x10   :  { %84 = vperm.xlu0 %428, %v541_v17   ;;  %74 = vperm.xlu1 %429, %v546_v18  }
  0x12   :  { %64 = vperm.xlu2 %430, %v568_v24  }
  0x15   :  { %417 = vmatpush.bf16.xpose.msra.mxu2 %v124_v14  ;;  %138 = vmatpush.bf16.xpose.msra.mxu0 %v124_v14 }
  0x18   :  { %54 = vperm.xlu1 %429, %v20_v22   ;;  %49 = vperm.xlu0 %428, %v563_v23  }
  0x1a   :  { %431 = vset.pattern.permute.xlu2 %v470_v36 }
  0x1b   :  { %182 = vperm.xlu2 %431, %v563_v23  }
  0x1d   :  { %418 = vmatpush.bf16.xpose.msra.mxu2 %v121_v21  ;;  %139 = vmatpush.bf16.xpose.msra.mxu0 %v121_v21 }
  0x20   :  { %433 = vset.pattern.permute.xlu1 %v470_v36  ;;  %432 = vset.pattern.permute.xlu0 %v470_v36 }
  0x21   :  { %190 = vperm.xlu1 %433, %v551_v19   ;;  %186 = vperm.xlu0 %432, %v20_v22  }
  0x23   :  { %194 = vperm.xlu2 %431, %v568_v24  }
  0x24   :  { %385 = vmatmul.msk.bf16.vlgmr.msra.gmra.mxu2 %vm107_vm0, %v409_v25  ;;  %383 = vmatmul.msk.bf16.vlgmr.msra.gmra.mxu0 %vm107_vm0, %v407_v26 }
  0x29   :  { %198 = vperm.xlu1 %433, %v520_v7   ;;  %434 = vset.pattern.permute.xlu0 %v471_v58 }
  0x2a   :  { %284 = vperm.xlu0 %434, %v563_v23  }
  0x2b   :  { %202 = vperm.xlu2 %431, %v546_v18  }
  0x31   :  { %435 = vset.pattern.permute.xlu1 %v471_v58 }
  0x32   :  { %288 = vperm.xlu1 %435, %v20_v22   ;;  %300 = vperm.xlu0 %434, %v520_v7   ;;  %v413_v7 = vld [vmem:[%s637_s2 + $0x10] sm:$0xff] }
  0x33   :  { %436 = vset.pattern.permute.xlu2 %v471_v58 }
  0x34   :  { %386 = vmatmul.msk.bf16.gmra.mxu2 %vm107_vm0, %v410_v27  ;;  %384 = vmatmul.msk.bf16.gmra.mxu0 %vm107_vm0, %v408_v28 }
  0x35   :  { %292 = vperm.xlu2 %436, %v551_v19  }
  0x3a   :  { %296 = vperm.xlu1 %435, %v568_v24   ;;  %308 = vperm.xlu0 %434, %v515_v6  }
  0x3d   :  { %437 = vset.pattern.permute.xlu2 %v470_v36 }
  0x3e   :  { %206 = vperm.xlu2 %437, %v515_v6   ;;  %v414_v6 = vld [vmem:[%s637_s2 + $0x18] sm:$0xff]  ;;  %s473_s2 = smov [#allocation2]  }
  0x3f   :  { %s356_s8 = sshll.u32 %s473_s2, 4  ;;  %s357_s8 = int_to_ptr.vmem [resolvable:$true] %s356_s8 }
  0x42   :  { %438 = vset.pattern.permute.xlu1 %v470_v36  ;;  %442 = vset.pattern.permute.xlu0 %v472_v5 }
  0x43   :  { %210 = vperm.xlu1 %438, %v541_v17  }
  0x46   :  { %439 = vset.pattern.permute.xlu2 %v471_v58 }
  0x47   :  { %304 = vperm.xlu2 %439, %v546_v18  }
  0x4b   :  { %440 = vset.pattern.permute.xlu1 %v471_v58 }
  0x4c   :  { %312 = vperm.xlu1 %440, %v541_v17  }
  0x4f   :  { %441 = vset.pattern.permute.xlu2 %v472_v5 }
  0x50   :  { %345 = vperm.xlu2 %441, %v563_v23  }
  0x64   :  { %v60_v35 = vpop.permute.xlu2 %59 }
  0x6c   :  { %v65_v46 = vpop.permute.xlu2 %64 }
  0x75   :  { %v183_v8 = vpop.permute.xlu2 %182 }
  0x7a   :  { %v80_v33 = vpop.permute.xlu0 %79  ;;  %v70_v34 = vpop.permute.xlu1 %69 }
  0x7d   :  { %v195_v10 = vpop.permute.xlu2 %194 }
  0x82   :  { %v85_v39 = vpop.permute.xlu0 %84  ;;  %v75_v40 = vpop.permute.xlu1 %74 }
  0x85   :  { %v203_v13 = vpop.permute.xlu2 %202 }
  0x8a   :  { %v50_v51 = vpop.permute.xlu0 %49  ;;  %v55_v55 = vpop.permute.xlu1 %54 }
  0x8f   :  { %v293_v18 = vpop.permute.xlu2 %292 }
  0x93   :  { %v191_v9 = vpop.permute.xlu1 %190  ;;  %v187_v16 = vpop.permute.xlu0 %186 }
  0x98   :  { %v207_v27 = vpop.permute.xlu2 %206 }
  0x9b   :  { %v199_v12 = vpop.permute.xlu1 %198 }
  0x9c   :  { %v285_v23 = vpop.permute.xlu0 %284 }
  0xa1   :  { %v141_v29 = vpop.f32.mrf.mxu0 }
  0xa2   :  { %v142_v57 = vadd.f32 %v141_v29, %v50_v51 }
  0xa4   :  { %v161_v0 = vmax.f32 %v142_v57, 0.0  ;;  %v289_v17 = vpop.permute.xlu1 %288 }
  0xa7   :  { %v151_v30 = vpop.f32.mrf.mxu2 }
  0xa8   :  { %v152_v47 = vadd.f32 %v151_v30, %v70_v34  ;;  %v301_v34 = vpop.permute.xlu0 %300 }
  0xa9   :  { %v143_v31 = vpop.f32.mrf.mxu0 }
  0xaa   :  { %v165_v56 = vmax.f32 %v152_v47, 0.0  ;;  %v144_v59 = vadd.f32 %v143_v31, %v55_v55 }
  0xac   :  { %v162_v63 = vmax.f32 %v144_v59, 0.0  ;;  %v297_v25 = vpop.permute.xlu1 %296 }
  0xae   :  { %v177_v2 = vpack.c.bf16 %v162_v63, %v161_v0 }
  0xaf   :  { %v153_v32 = vpop.f32.mrf.mxu2 }
  0xb0   :  { %v154_v43 = vadd.f32 %v153_v32, %v75_v40  ;;  %v309_v55 = vpop.permute.xlu0 %308 }
  0xb1   :  { %v146_v37 = vpop.f32.mrf.mxu0 }
  0xb2   :  { %v166_v50 = vmax.f32 %v154_v43, 0.0  ;;  %v147_v52 = vadd.f32 %v146_v37, %v60_v35 }
  0xb4   :  { %v163_v60 = vmax.f32 %v147_v52, 0.0  ;;  %v179_v62 = vpack.c.bf16 %v166_v50, %v165_v56 }
  0xb7   :  { %v156_v38 = vpop.f32.mrf.mxu2 }
  0xb8   :  { %v157_v41 = vadd.f32 %v156_v38, %v80_v33 }
  0xb9   :  { %v148_v45 = vpop.f32.mrf.mxu0 }
  0xba   :  { %v167_v48 = vmax.f32 %v157_v41, 0.0  ;;  %v149_v53 = vadd.f32 %v148_v45, %v65_v46 }
  0xbc   :  { %v164_v61 = vmax.f32 %v149_v53, 0.0 }
  0xbe   :  { %v178_v1 = vpack.c.bf16 %v164_v61, %v163_v60 }
  0xbf   :  { %v158_v42 = vpop.f32.mrf.mxu2 }
  0xc0   :  { %v159_v44 = vadd.f32 %v158_v42, %v85_v39  ;;  %v211_v42 = vpop.permute.xlu1 %210 }
  0xc2   :  { %v168_v49 = vmax.f32 %v159_v44, 0.0 }
  0xc4   :  { %v180_v54 = vpack.c.bf16 %v168_v49, %v167_v48  ;;  %v305_v48 = vpop.permute.xlu2 %304 }
  0xc6   :  { %250 = vmatpush.bf16.msra.mxu1 %v180_v54  ;;  %419 = vmatpush.bf16.msra.mxu3 %v180_v54 }
  0xc8   :  { %v313_v63 = vpop.permute.xlu1 %312 }
  0xca   :  { %251 = vmatpush.bf16.msra.mxu1 %v179_v62  ;;  %420 = vmatpush.bf16.msra.mxu3 %v179_v62 }
  0xce   :  { %252 = vmatpush.bf16.msra.mxu1 %v178_v1  ;;  %421 = vmatpush.bf16.msra.mxu3 %v178_v1 }
  0xd2   :  { %253 = vmatpush.bf16.msra.mxu1 %v177_v2  ;;  %422 = vmatpush.bf16.msra.mxu3 %v177_v2 }
  0xd5   :  { %403 = vmatmul.msk.bf16.vlgmr.msra.gmra.mxu1 %vm233_vm1, %v411_v3  ;;  %404 = vmatmul.msk.bf16.vlgmr.msra.gmra.mxu3 %vm233_vm1, %v412_v4 }
  0xe5   :  { %405 = vmatmul.msk.bf16.gmra.mxu3 %vm233_vm1, %v413_v7 }
  0xf5   :  { %406 = vmatmul.msk.bf16.gmra.mxu3 %vm233_vm1, %v414_v6 }
 0x152   :  { %v255_v14 = vpop.f32.mrf.mxu1 }
 0x153   :  { %v256_v22 = vadd.f32 %v255_v14, %v183_v8 }
 0x155   :  { %v275_v26 = vmax.f32 %v256_v22, 0.0 }
 0x157   :  { %v315_v33 = vmul.f32 %v285_v23, %v275_v26 }
 0x158   :  { %v260_v11 = vpop.f32.mrf.mxu3 }
 0x159   :  { %v261_v29 = vadd.f32 %v260_v11, %v191_v9  ;;  %v323_v40 = vsel %vm233_vm1, %v315_v33, 0.0 }
 0x15a   :  { %v257_v19 = vpop.f32.mrf.mxu1 }
 0x15b   :  { %v258_v21 = vadd.f32 %v257_v19, %v187_v16  ;;  %v277_v35 = vmax.f32 %v261_v29, 0.0 }
 0x15d   :  { %v276_v24 = vmax.f32 %v258_v21, 0.0  ;;  %v317_v43 = vmul.f32 %v293_v18, %v277_v35 }
 0x15f   :  { %v316_v31 = vmul.f32 %v289_v17, %v276_v24  ;;  %v326_v51 = vsel %vm233_vm1, %v317_v43, 0.0 }
 0x160   :  { %v262_v15 = vpop.f32.mrf.mxu3 }
 0x161   :  { %v263_v30 = vadd.f32 %v262_v15, %v195_v10  ;;  %v324_v38 = vsel %vm233_vm1, %v316_v31, 0.0 }
 0x162   :  { %v325_v47 = vadd.f32 %v324_v38, %v323_v40 }
 0x163   :  { %v278_v36 = vmax.f32 %v263_v30, 0.0 }
 0x164   :  { %v327_v54 = vadd.f32 %v326_v51, %v325_v47 }
 0x165   :  { %v318_v44 = vmul.f32 %v297_v25, %v278_v36 }
 0x167   :  { %v328_v52 = vsel %vm233_vm1, %v318_v44, 0.0 }
 0x168   :  { %v265_v20 = vpop.f32.mrf.mxu3  ;;  %v329_v58 = vadd.f32 %v328_v52, %v327_v54 }
 0x169   :  { %v266_v32 = vadd.f32 %v265_v20, %v199_v12  ;;  %v346_v12 = vpop.permute.xlu2 %345 }
 0x16b   :  { %v279_v39 = vmax.f32 %v266_v32, 0.0 }
 0x16d   :  { %v319_v49 = vmul.f32 %v301_v34, %v279_v39 }
 0x16f   :  { %v330_v56 = vsel %vm233_vm1, %v319_v49, 0.0 }
 0x170   :  { %v267_v28 = vpop.f32.mrf.mxu3  ;;  %v331_v62 = vadd.f32 %v330_v56, %v329_v58 }
 0x171   :  { %v268_v37 = vadd.f32 %v267_v28, %v203_v13 }
 0x173   :  { %v280_v45 = vmax.f32 %v268_v37, 0.0 }
 0x175   :  { %v320_v53 = vmul.f32 %v305_v48, %v280_v45 }
 0x177   :  { %v332_v60 = vsel %vm233_vm1, %v320_v53, 0.0 }
 0x178   :  { %v270_v41 = vpop.f32.mrf.mxu3  ;;  %v333_v2 = vadd.f32 %v332_v60, %v331_v62 }
 0x179   :  { %v271_v46 = vadd.f32 %v270_v41, %v207_v27 }
 0x17b   :  { %v281_v50 = vmax.f32 %v271_v46, 0.0 }
 0x17d   :  { %v321_v57 = vmul.f32 %v309_v55, %v281_v50 }
 0x17f   :  { %v334_v0 = vsel %vm233_vm1, %v321_v57, 0.0 }
 0x180   :  { %v272_v59 = vpop.f32.mrf.mxu3  ;;  %v335_v4 = vadd.f32 %v334_v0, %v333_v2 }
 0x181   :  { %v273_v61 = vadd.f32 %v272_v59, %v211_v42 }
 0x183   :  { %v282_v1 = vmax.f32 %v273_v61, 0.0 }
 0x185   :  { %v322_v3 = vmul.f32 %v313_v63, %v282_v1 }
 0x187   :  { %v336_v5 = vsel %vm233_vm1, %v322_v3, 0.0 }
 0x188   :  { %v337_v7 = vadd.f32 %v336_v5, %v335_v4 }
 0x18a   :  { %v338_v6 = vrot.slane %v337_v7, 4 }
 0x18c   :  { %v339_v8 = vadd.f32 %v338_v6, %v337_v7 }
 0x18e   :  { %v340_v9 = vrot.slane %v339_v8, 2 }
 0x190   :  { %v341_v10 = vadd.f32 %v340_v9, %v339_v8 }
 0x192   :  { %v342_v11 = vrot.slane %v341_v10, 1 }
 0x194   :  { %v343_v13 = vadd.f32 %v342_v11, %v341_v10 }
 0x196   :  { %v348_v14 = vadd.f32 %v346_v12, %v343_v13 }
 0x198   :  { %350 = vst.msk [vmem:[#allocation2] sm:$0x1] %vm349_vm2, %v348_v14 }
 0x199   :  { %361 = dma.vmem_to_hbm [thread:$0]  %s357_s8, 16, %s359_s11, [#allocation3]  }
 0x19a   :  { %467 = dma.done.wait [#allocation3], 16  }
 0x19b   :  { %468 = vsyncadd [#allocation3], 4294967280 }
 0x19c   :  { %366 = vsyncpa [#allocation3], 1 }

</bundles_post_ra>
